<compile_context>
chip_gen: v7x
topology: tpu7x:2x2x1
jax: 0.10.0
libtpu: 0.0.40
codegen_flags: <defaults>
</compile_context>

<pallas_src>
import jax
import jax.numpy as jnp
from jax.experimental import pallas as pl
from jax.experimental.pallas import tpu as pltpu

N, M = 8, 128  # small, TPU-tile-friendly shapes (sublane=8, lane=128)


# ---------------- fused Pallas kernel ----------------

def _fused_kernel(w_ref, x_ref, s_ref, mv_ref, add_ref):
    """One pass: scalar sum, VPU mat-vec, broadcast add."""
    w = w_ref[...]                 # (N, M) f32
    x = x_ref[...]                 # (1, M) f32

    # scalar branch condition: sum(inp) -> SMEM
    s_ref[0, 0] = jnp.sum(x)

    # branch 2: weight + inp (broadcast over rows)
    add_ref[...] = w + x

    # branch 1: weight.mv(inp) on VPU (+ XLU lane reduce); skip the MXU for a
    # K=128, Nout=1 matvec.  Broadcast the (N,1) column across all 128 lanes so
    # the store is a full, unmasked (8,128) tile; the wrapper slices column 0.
    prod = w * x                                           # (N, M)   VPU
    mv_col = jnp.sum(prod, axis=1, keepdims=True)          # (N, 1)   XLU
    mv_ref[...] = jnp.broadcast_to(mv_col, mv_ref.shape)   # (N, M)   lane-dense store


# ---------------- jitted wrapper (single launch) ----------------

@jax.jit
def _fused_forward(weight, inp):
    x_row = inp.reshape(1, M).astype(jnp.float32)
    s, mv_full, add_out = pl.pallas_call(
        _fused_kernel,
        out_shape=(
            jax.ShapeDtypeStruct((1, 1), jnp.float32),     # sum (SMEM)
            jax.ShapeDtypeStruct((N, M), jnp.float32),     # mat-vec, lane-broadcast
            jax.ShapeDtypeStruct((N, M), jnp.float32),     # broadcast add
        ),
        in_specs=[pl.BlockSpec((N, M), lambda: (0, 0)),
                  pl.BlockSpec((1, M), lambda: (0, 0))],
        out_specs=(pl.BlockSpec(memory_space=pltpu.SMEM),
                   pl.BlockSpec((N, M), lambda: (0, 0)),
                   pl.BlockSpec((N, M), lambda: (0, 0))),
    )(weight.astype(jnp.float32), x_row)
    mv = mv_full[:, 0]             # (N,) — tiny fused XLA slice inside the jit
    return s[0, 0], mv, add_out


def my_module_forward(weight, inp):
    """Exact semantics of MyModule.forward (eager, data-dependent branch)."""
    s, mv, add_out = _fused_forward(weight, inp)
    # Single host sync per forward; required by PyTorch eager branch semantics
    # (the two branches return different shapes, so the pick must be on host).
    if float(s) > 0:
        return mv                  # (N,)
    else:
        return add_out             # (N, M)


# ---------------- main ----------------

if __name__ == "__main__":
    key = jax.random.PRNGKey(0)
    k_w, k_x = jax.random.split(key)

    # torch.rand(N, M) -> uniform [0, 1)
    weight = jax.random.uniform(k_w, (N, M), dtype=jnp.float32)

    # example input vector (M,)
    inp = jax.random.normal(k_x, (M,), dtype=jnp.float32)

    # run forward on inp (one branch) and on -inp (other branch)
    out_a = jax.block_until_ready(my_module_forward(weight, inp))
    out_b = jax.block_until_ready(my_module_forward(weight, -inp))

    # reference checks
    def ref_forward(w, x):
        if float(jnp.sum(x)) > 0:
            return w @ x
        else:
            return w + x[None, :]

    ref_a = ref_forward(weight, inp)
    ref_b = ref_forward(weight, -inp)

    assert out_a.shape == ref_a.shape and out_b.shape == ref_b.shape
    assert jnp.allclose(out_a, ref_a, atol=1e-4, rtol=1e-5)
    assert jnp.allclose(out_b, ref_b, atol=1e-4, rtol=1e-5)

    print("KERNEL_OK")
</pallas_src>

<mosaic_0001>
module attributes {stable_mosaic.version = 11 : i64} {
  func.func @_fused_kernel(%arg0: memref<8x128xf32, #tpu.memory_space<vmem>>, %arg1: memref<1x128xf32, #tpu.memory_space<vmem>>, %arg2: memref<1x1xf32, #tpu.memory_space<smem>>, %arg3: memref<8x128xf32, #tpu.memory_space<vmem>>, %arg4: memref<8x128xf32, #tpu.memory_space<vmem>>) attributes {dimension_semantics = [], scalar_prefetch = 0 : i64, scratch_operands = 0 : i64, tpu.core_type = #tpu.core_type<tc>} {
    %c0 = arith.constant 0 : index
    %c0_0 = arith.constant 0 : index
    %0 = vector.load %arg0[%c0, %c0_0] : memref<8x128xf32, #tpu.memory_space<vmem>>, vector<8x128xf32>
    %c0_1 = arith.constant 0 : index
    %c0_2 = arith.constant 0 : index
    %1 = vector.load %arg1[%c0_1, %c0_2] : memref<1x128xf32, #tpu.memory_space<vmem>>, vector<1x128xf32>
    %2 = vector.shape_cast %1 : vector<1x128xf32> to vector<1x1x128xf32>
    %cst = arith.constant dense<0.000000e+00> : vector<1xf32>
    %3 = vector.multi_reduction <add>, %2, %cst [1, 2] : vector<1x1x128xf32> to vector<1xf32>
    %4 = vector.shape_cast %3 : vector<1xf32> to vector<1x1x1xf32>
    %5 = vector.extract %4[0, 0, 0] : f32 from vector<1x1x1xf32>
    %c0_3 = arith.constant 0 : index
    %c0_4 = arith.constant 0 : index
    %6 = memref.load %arg2[%c0_3, %c0_4] : memref<1x1xf32, #tpu.memory_space<smem>>
    memref.store %5, %arg2[%c0_3, %c0_4] : memref<1x1xf32, #tpu.memory_space<smem>>
    %7 = vector.broadcast %1 : vector<1x128xf32> to vector<8x128xf32>
    %8 = arith.addf %0, %7 : vector<8x128xf32>
    %c0_5 = arith.constant 0 : index
    %c0_6 = arith.constant 0 : index
    %9 = vector.load %arg4[%c0_5, %c0_6] : memref<8x128xf32, #tpu.memory_space<vmem>>, vector<8x128xf32>
    tpu.vector_store %arg4[%c0_5, %c0_6], %8 {strides = array<i32>} : memref<8x128xf32, #tpu.memory_space<vmem>>, vector<8x128xf32>,
    %10 = vector.broadcast %1 : vector<1x128xf32> to vector<8x128xf32>
    %11 = arith.mulf %0, %10 : vector<8x128xf32>
    %cst_7 = arith.constant dense<0.000000e+00> : vector<8xf32>
    %12 = vector.multi_reduction <add>, %11, %cst_7 [1] : vector<8x128xf32> to vector<8xf32>
    %13 = vector.shape_cast %12 : vector<8xf32> to vector<8x1xf32>
    %14 = vector.shape_cast %13 : vector<8x1xf32> to vector<8x1xf32>
    %15 = vector.broadcast %14 : vector<8x1xf32> to vector<8x128xf32>
    %c0_8 = arith.constant 0 : index
    %c0_9 = arith.constant 0 : index
    %16 = vector.load %arg3[%c0_8, %c0_9] : memref<8x128xf32, #tpu.memory_space<vmem>>, vector<8x128xf32>
    tpu.vector_store %arg3[%c0_8, %c0_9], %15 {strides = array<i32>} : memref<8x128xf32, #tpu.memory_space<vmem>>, vector<8x128xf32>,
    return
  }
}

</mosaic_0001>

<bundles_post_ra>
// kernel: _fused_forward.1
= control target key start
LH: loop header
LB: loop body
LE: loop exit
PB: predicated region body
PF: predicated region fallthrough
CT: control target
= control target key end

     0   :  { %10 = vsyncpa [#allocation3], 0  ;;  %s222_s0 = inlined_call_operand.hbm [shape: f32[8,128], index: 0, kind: input, shape index: {}]   ;;  %s223_s1 = inlined_call_operand.vmem [shape: f32[1,128], index: 1, kind: input, shape index: {}]   ;;  %s224_s2 = inlined_call_operand.hbm [shape: f32[1,1], index: 2, kind: output, shape index: {0}]   ;;  %s225_s3 = inlined_call_operand.vmem [shape: f32[8,128], index: 3, kind: output, shape index: {1}]   ;;  %s226_s4 = inlined_call_operand.hbm [shape: f32[8,128], index: 4, kind: output, shape index: {2}]  }
   0x1   :  { %11 = vsyncpa [#allocation5], 0 }
   0x2   :  { %12 = vsyncpa [#allocation4], 0  ;;  %s152_s15 = smov [#allocation2]   ;;  %s92_s19 = scalar_lea.hbm %s222_s0, 128 }
   0x3   :  { %s19_s16 = sshll.u32 %s152_s15, 4  ;;  %p93_p0 = scmp.ne.s32.totalorder %s222_s0, %s92_s19  ;;  %s20_s16 = int_to_ptr.vmem [resolvable:$true] %s19_s16 }
   0x4   :  { %p96_p1 = scmp.lt.u32.totalorder %s92_s19, %s222_s0 }
   0x6   :  { %p98_p2 = pnand %p96_p1, %p93_p0 }
   0x8   :  { %101 = shalt.err (!%p98_p2)
}
   0x9   :  { %s102_s24 = scalar_lea.vmem %s20_s16, 128  ;;  %p107_p4 = scmp.lt.s32.totalorder %s20_s16, %s20_s16 }
   0xa   :  { %p103_p3 = scmp.ne.s32.totalorder %s20_s16, %s102_s24  ;;  %p108_p5 = scmp.lt.s32.totalorder %s102_s24, %s102_s24 }
   0xc   :  { %p109_p6 = por %p108_p5, %p107_p4 }
   0xe   :  { %p110_p7 = pnand %p109_p6, %p103_p3 }
  0x10   :  { %113 = shalt.err (!%p110_p7)
}
  0x11   :  { %22 = dma.hbm_to_vmem [thread:$0]  %s222_s0, 128, %s20_s16, [#allocation3]  }
  0x12   :  { %146 = dma.done.wait [#allocation3], 128  }
  0x13   :  { %147 = vsyncadd [#allocation3], 4294967168  ;;  %v44_v0 = vlaneseq  ;;  %vm30_vm0 = vcmask 1040384   ;;  %v29_v3 = vld [vmem:[%s223_s1] sm:$0x1]  ;;  %s153_s29 = smov [#allocation7]  }
  0x14   :  { %v28_v4 = vld [vmem:[#allocation2] sm:$0xff]  ;;  %v31_v5 = vsel %vm30_vm0, %v29_v3, 0.0  ;;  %s71_s0 = sshll.u32 %s153_s29, 4  ;;  %s72_s0 = int_to_ptr.vmem [resolvable:$true] %s71_s0 }
  0x15   :  { %v45_v1 = vshrl.u32 %v44_v0, 7  ;;  %32 = vadd.xlane.f32.xlu0 %v31_v5  ;;  %s114_s30 = scalar_lea.vmem %s72_s0, 128  ;;  %p119_p9 = scmp.lt.s32.totalorder %s72_s0, %s72_s0 }
  0x16   :  { %p115_p8 = scmp.ne.s32.totalorder %s72_s0, %s114_s30  ;;  %p120_p10 = scmp.lt.s32.totalorder %s114_s30, %s114_s30 }
  0x17   :  { %v46_v2 = vsub.s32 0, %v45_v1 }
  0x18   :  { %p121_p11 = por %p120_p10, %p119_p9 }
  0x19   :  { %v47_v6 = vrot.slane %v29_v3, %v46_v2 }
  0x1a   :  { %p122_p12 = pnand %p121_p11, %p115_p8 }
  0x1b   :  { %v51_v7 = vmul.f32 %v47_v6, %v28_v4  ;;  %v49_v8 = vadd.f32 %v47_v6, %v28_v4 }
  0x1d   :  { %50 = vst [vmem:[#allocation7] sm:$0xff] %v49_v8  ;;  %52 = vadd.xlane.f32.xlu0 %v51_v7 }
  0x1e   :  { %125 = shalt.err (!%p122_p12)
}
  0x1f   :  { %s126_s6 = scalar_lea.hbm %s226_s4, 128 }
  0x20   :  { %p127_p13 = scmp.ne.s32.totalorder %s226_s4, %s126_s6  ;;  %p130_p0 = scmp.lt.u32.totalorder %s126_s6, %s226_s4 }
  0x22   :  { %p132_p1 = pnand %p130_p0, %p127_p13 }
  0x24   :  { %135 = shalt.err (!%p132_p1)
}
  0x25   :  { %74 = dma.vmem_to_hbm [thread:$0]  %s72_s0, 128, %s226_s4, [#allocation4]  }
  0x26   :  { %s136_s18 = scalar_lea.hbm %s224_s2, 16 }
  0x27   :  { %p137_p2 = scmp.ne.s32.totalorder %s224_s2, %s136_s18  ;;  %p140_p3 = scmp.lt.u32.totalorder %s136_s18, %s224_s2 }
  0x29   :  { %p142_p4 = pnand %p140_p3, %p137_p2 }
  0xa2   :  { %v33_v9 = vpop.xlane.xlu0 %32 }
  0xa3   :  { %v34_v10 = vrot.slane %v33_v9, 4 }
  0xa5   :  { %v35_v11 = vadd.f32 %v34_v10, %v33_v9 }
  0xa7   :  { %v36_v13 = vrot.slane %v35_v11, 2 }
  0xa9   :  { %v37_v14 = vadd.f32 %v36_v13, %v35_v11 }
  0xaa   :  { %v53_v12 = vpop.xlane.xlu0 %52 }
  0xab   :  { %54 = vst [vmem:[%s225_s3] sm:$0xff] %v53_v12  ;;  %v38_v15 = vrot.slane %v37_v14, 1 }
  0xad   :  { %v39_v16 = vadd.f32 %v38_v15, %v37_v14 }
  0xaf   :  { %87 = vpush %v39_v16 }
  0xe0   :  { %s88_s15 = spop %87 }
  0xe1   :  { %42 = sst [smem:[#allocation6]] %s88_s15 }
  0xe2   :  { %145 = shalt.err (!%p142_p4)
}
  0xe3   :  { %s154_s3 = smov [#allocation6]  }
  0xe4   :  { %62 = dma.smem_to_hbm %s154_s3, 16, %s224_s2, [#allocation5]  }
  0xe5   :  { %148 = dma.done.wait [#allocation5], 16  }
  0xe6   :  { %149 = vsyncadd [#allocation5], 4294967280 }
  0xe7   :  { %150 = dma.done.wait [#allocation4], 128  }
  0xe8   :  { %151 = vsyncadd [#allocation4], 4294967168 }
  0xe9   :  { %83 = sfence }
  0xea   :  { %84 = vsyncpa [#allocation3], 1 }
  0xeb   :  { %85 = vsyncpa [#allocation4], 1 }
  0xec   :  { %86 = vsyncpa [#allocation5], 1 }

</bundles_post_ra>
